<compile_context>
chip_gen: v7x
topology: tpu7x:2x2x1
jax: 0.10.0
libtpu: 0.0.40
codegen_flags: <defaults>
</compile_context>

<pallas_src>
import functools

import jax
import jax.numpy as jnp
from jax.experimental import pallas as pl
from jax.experimental.pallas import tpu as pltpu


def _round_up(a, b):
    return ((a + b - 1) // b) * b


# ---------------------------------------------------------------------------
# Kernel
# ---------------------------------------------------------------------------
def _ffn_kernel(compute_dtype, k_tiles, tf,
                x_ref, w1_ref, b1_ref, w2_ref, b2_ref, o_ref, acc_ref):
    k = pl.program_id(1)

    @pl.when(k == 0)
    def _():
        acc_ref[...] = jnp.zeros_like(acc_ref)

    # Linear1 chunk: relu(x @ W1[:, chunk] + b1[chunk]).
    # bf16 operands on the MXU, f32 accumulate; bias add + ReLU in f32 on VPU.
    x = x_ref[...].astype(compute_dtype)          # in-kernel cast (x stays f32 in HBM)
    h = jnp.dot(x, w1_ref[...], preferred_element_type=jnp.float32)
    if k_tiles == 1:
        b1c = b1_ref[...]                          # resident path: full bias
    else:
        # streaming path: tf is a multiple of 128 -> aligned lane slice.
        b1c = b1_ref[:, pl.ds(pl.multiple_of(k * tf, 128), tf)]
    h = jnp.maximum(h + b1c, 0.0)
    # TODO(synk): dropout is identity at inference; a training-mode variant
    # needs pltpu.prng_seed / prng_random_bits with a per-grid-step offset.

    # Linear2 chunk accumulated into the resident f32 accumulator.
    acc_ref[...] += jnp.dot(h.astype(compute_dtype), w2_ref[...],
                            preferred_element_type=jnp.float32)

    @pl.when(k == pl.num_programs(1) - 1)
    def _():
        o_ref[...] = (acc_ref[...] + b2_ref[...]).astype(o_ref.dtype)


# ---------------------------------------------------------------------------
# Sizing helpers
# ---------------------------------------------------------------------------
def _vmem_budget_bytes():
    cap = 64 * 1024 * 1024            # conservative fallback (v7x per-TC VMEM)
    try:
        info = pltpu.get_tpu_info()
        cap = int(getattr(info, "vmem_capacity_bytes", cap))
    except Exception:
        pass
    # ~75% of physical leaves headroom for compiler-internal scratch and
    # double-buffering: ~48 MiB on v7x, ~96 MiB (capped 100 MiB) on v5e/v6e.
    return int(min(cap * 3 // 4, 100 * 1024 * 1024))


def _vmem_estimate(tm, tf, d_model, d_ff, cb, xb, ob):
    return (2 * tm * d_model * xb          # x tile (double-buffered, HBM dtype)
            + 2 * tm * d_model * ob        # out tile (double-buffered)
            + tm * d_model * 4             # f32 accumulator scratch
            + tm * d_model * cb            # in-kernel bf16 copy of x tile
            + tm * tf * (4 + cb)           # hidden chunk (f32 + bf16 cast)
            + 2 * d_model * tf * cb        # W1 block (double-buffered)
            + 2 * tf * d_model * cb        # W2 block (double-buffered)
            + 2 * (d_ff + d_model) * 4)    # biases


def _choose_tiles(M, d_model, d_ff, budget, cb, xb, ob):
    """Pick (tm, tf): row tile over M and column tile over d_ff."""
    align = 16                             # bf16 sublane packing on the row dim
    m_cap = _round_up(M, align)

    def fits(tm, tf):
        return _vmem_estimate(tm, tf, d_model, d_ff, cb, xb, ob) <= budget

    # d_ff tiles: prefer fully-resident weights (tf == d_ff -> DMA'd once per
    # call), then multiple-of-128 divisors of d_ff, descending.
    tf_candidates = [d_ff]
    if d_ff % 128 == 0 and d_ff > 128:
        for c in range(min(d_ff - 128, 4096), 0, -128):
            if d_ff % c == 0:
                tf_candidates.append(c)
    # TODO(synk): if d_ff is large and not a multiple of 128 the single-block
    # fallback may exceed VMEM; pad d_ff in that case.

    # Row tiles: roofline wants tm large (>=512 keeps v5e/v7x MXU-bound,
    # ~1024 for v6e); capped by M and the VMEM budget.
    tm_candidates = []
    for t in (1024, 768, 512, 384, 256, 192, 128, 64, 32, 16):
        t = max(align, min(_round_up(t, align), m_cap))
        if t not in tm_candidates:
            tm_candidates.append(t)

    # First pass insists on a reasonably large row tile (arithmetic
    # intensity); second pass takes whatever fits.
    for tm_floor in (min(256, m_cap), 0):
        for tf in tf_candidates:
            for tm in tm_candidates:
                if tm < tm_floor:
                    continue
                if fits(tm, tf):
                    return tm, tf
    return tm_candidates[-1], tf_candidates[-1]


# ---------------------------------------------------------------------------
# Wrapper
# ---------------------------------------------------------------------------
def positionwise_feed_forward(x, w1, b1, w2, b2, *,
                              compute_dtype=jnp.bfloat16, out_dtype=None):
    """x: (batch, seq, d_model). Weights pre-transposed vs torch.nn.Linear:
    W1 (d_model, d_ff), W2 (d_ff, d_model); biases (d_ff,)/(1,d_ff) and
    (d_model,)/(1,d_model). Pass weights already cast to `compute_dtype` to
    avoid a per-call cast. Returns (batch, seq, d_model) in `out_dtype`
    (defaults to x.dtype)."""
    batch, seq, d_model = x.shape
    d_ff = w1.shape[1]
    M = batch * seq
    out_dtype = x.dtype if out_dtype is None else jnp.dtype(out_dtype)

    cb = jnp.dtype(compute_dtype).itemsize
    xb = jnp.dtype(x.dtype).itemsize
    ob = jnp.dtype(out_dtype).itemsize

    budget = _vmem_budget_bytes()
    tm, tf = _choose_tiles(M, d_model, d_ff, budget, cb, xb, ob)

    # v7x megacore: prefer an even number of row tiles so the "parallel" axis
    # splits evenly across the two TensorCores.
    m_tiles = pl.cdiv(M, tm)
    if m_tiles > 1 and m_tiles % 2 == 1:
        tm_even = max(16, _round_up(pl.cdiv(M, m_tiles + 1), 16))
        if pl.cdiv(M, tm_even) % 2 == 0:
            tm = tm_even
            m_tiles = pl.cdiv(M, tm)

    k_tiles = d_ff // tf
    grid = (m_tiles, k_tiles)

    # Weights should arrive pre-cast (hoisted to init); these are no-ops then.
    w1c = w1 if w1.dtype == compute_dtype else w1.astype(compute_dtype)
    w2c = w2 if w2.dtype == compute_dtype else w2.astype(compute_dtype)
    b1f = b1.reshape(1, d_ff).astype(jnp.float32)
    b2f = b2.reshape(1, d_model).astype(jnp.float32)

    # x stays in its HBM dtype: no astype / no pad copies on the wrapper side.
    x2d = x.reshape(M, d_model)

    est = _vmem_estimate(tm, tf, d_model, d_ff, cb, xb, ob)
    vmem_limit = int(min(budget, max(32 * 1024 * 1024, int(1.5 * est))))

    # Weight HBM traffic: once per call when resident (k_tiles == 1), once per
    # M tile when streaming.
    weight_passes = 1 if k_tiles == 1 else m_tiles
    flops = 4 * M * d_model * d_ff
    bytes_accessed = (M * d_model * xb
                      + weight_passes * 2 * d_model * d_ff * cb
                      + (d_ff + d_model) * 4
                      + M * d_model * ob)

    kernel = functools.partial(_ffn_kernel, compute_dtype, k_tiles, tf)

    out2d = pl.pallas_call(
        kernel,
        out_shape=jax.ShapeDtypeStruct((M, d_model), out_dtype),
        grid_spec=pltpu.PrefetchScalarGridSpec(
            num_scalar_prefetch=0,
            grid=grid,
            in_specs=[
                pl.BlockSpec((tm, d_model), lambda i, k: (i, 0)),   # x row tile
                pl.BlockSpec((d_model, tf), lambda i, k: (0, k)),   # W1 chunk
                pl.BlockSpec((1, d_ff), lambda i, k: (0, 0)),       # b1 (full, once)
                pl.BlockSpec((tf, d_model), lambda i, k: (k, 0)),   # W2 chunk
                pl.BlockSpec((1, d_model), lambda i, k: (0, 0)),    # b2 (once)
            ],
            out_specs=pl.BlockSpec((tm, d_model), lambda i, k: (i, 0)),
            scratch_shapes=[pltpu.VMEM((tm, d_model), jnp.float32)],
        ),
        compiler_params=pltpu.CompilerParams(
            dimension_semantics=("parallel", "arbitrary"),
            vmem_limit_bytes=vmem_limit,
        ),
        cost_estimate=pl.CostEstimate(
            flops=flops, transcendentals=0, bytes_accessed=bytes_accessed),
    )(x2d, w1c, b1f, w2c, b2f)

    return out2d.reshape(batch, seq, d_model)


def init_params(key, d_model, d_ff, dtype=jnp.float32):
    """Deterministic init mimicking nn.Linear's uniform(-1/sqrt(fan_in), ...)."""
    k1, k2, k3, k4 = jax.random.split(key, 4)
    bound1 = 1.0 / (d_model ** 0.5)
    bound2 = 1.0 / (d_ff ** 0.5)
    # Stored already transposed: (in_features, out_features)
    w1 = jax.random.uniform(k1, (d_model, d_ff), dtype, -bound1, bound1)
    b1 = jax.random.uniform(k2, (1, d_ff), dtype, -bound1, bound1)
    w2 = jax.random.uniform(k3, (d_ff, d_model), dtype, -bound2, bound2)
    b2 = jax.random.uniform(k4, (1, d_model), dtype, -bound2, bound2)
    return w1, b1, w2, b2


if __name__ == "__main__":
    batch, seq, d_model, d_ff = 2, 8, 32, 64

    key = jax.random.PRNGKey(0)
    kx, kp = jax.random.split(key)
    x = jax.random.normal(kx, (batch, seq, d_model), jnp.float32)
    w1, b1, w2, b2 = init_params(kp, d_model, d_ff)

    # Hoisted (one-time) weight casts to the MXU compute dtype.
    w1c = w1.astype(jnp.bfloat16)
    w2c = w2.astype(jnp.bfloat16)

    out = positionwise_feed_forward(x, w1c, b1, w2c, b2)
    out = jax.block_until_ready(out)
    assert out.shape == x.shape

    # Reference using the same bf16-operand / f32-accumulate math as the kernel.
    xb = x.reshape(-1, d_model).astype(jnp.bfloat16)
    h_ref = jnp.maximum(
        jnp.dot(xb, w1c, preferred_element_type=jnp.float32) + b1, 0.0)
    ref_bf16 = (jnp.dot(h_ref.astype(jnp.bfloat16), w2c,
                        preferred_element_type=jnp.float32) + b2
                ).reshape(batch, seq, d_model)
    assert jnp.allclose(out, ref_bf16, atol=1e-3, rtol=1e-2), \
        float(jnp.max(jnp.abs(out - ref_bf16)))

    # Loose check against the pure-f32 torch-equivalent reference
    # (bf16 matmul operands cause small, expected drift).
    ref_f32 = jnp.maximum(x @ w1 + b1[0], 0.0) @ w2 + b2[0]
    assert jnp.allclose(out, ref_f32, atol=5e-2, rtol=5e-2)

    print("KERNEL_OK")
</pallas_src>

<mosaic_0001>
module attributes {stable_mosaic.version = 11 : i64} {
  func.func @_ffn_kernel(%arg0: i32, %arg1: i32, %arg2: memref<16x32xf32, #tpu.memory_space<vmem>>, %arg3: memref<32x64xbf16, #tpu.memory_space<vmem>>, %arg4: memref<1x64xf32, #tpu.memory_space<vmem>>, %arg5: memref<64x32xbf16, #tpu.memory_space<vmem>>, %arg6: memref<1x32xf32, #tpu.memory_space<vmem>>, %arg7: memref<16x32xf32, #tpu.memory_space<vmem>>, %arg8: memref<16x32xf32, #tpu.memory_space<vmem>>) attributes {dimension_semantics = [#tpu.dimension_semantics<parallel>, #tpu.dimension_semantics<arbitrary>], iteration_bounds = array<i64: 1, 1>, scalar_prefetch = 0 : i64, scratch_operands = 1 : i64, tpu.core_type = #tpu.core_type<tc>, window_params = [{transform_indices = @transform_0, window_bounds = array<i64: 16, 32>}, {transform_indices = @transform_1, window_bounds = array<i64: 32, 64>}, {pipeline_mode = #tpu.pipeline_mode<synchronous>, transform_indices = @transform_2, window_bounds = array<i64: 1, 64>}, {transform_indices = @transform_3, window_bounds = array<i64: 64, 32>}, {pipeline_mode = #tpu.pipeline_mode<synchronous>, transform_indices = @transform_4, window_bounds = array<i64: 1, 32>}, {transform_indices = @transform_5, window_bounds = array<i64: 16, 32>}]} {
    %c0_i32 = arith.constant 0 : i32
    %0 = arith.cmpi eq, %arg1, %c0_i32 : i32
    %1 = arith.extui %0 : i1 to i32
    %c0_i32_0 = arith.constant 0 : i32
    %2 = arith.cmpi ne, %1, %c0_i32_0 : i32
    scf.if %2 {
      %cst_16 = arith.constant 0.000000e+00 : f32
      %21 = vector.broadcast %cst_16 : f32 to vector<16x32xf32>
      %c0_17 = arith.constant 0 : index
      %c0_18 = arith.constant 0 : index
      %22 = vector.load %arg8[%c0_17, %c0_18] : memref<16x32xf32, #tpu.memory_space<vmem>>, vector<16x32xf32>
      tpu.vector_store %arg8[%c0_17, %c0_18], %21 {strides = array<i32>} : memref<16x32xf32, #tpu.memory_space<vmem>>, vector<16x32xf32>,
    } else {
    }
    %c0 = arith.constant 0 : index
    %c0_1 = arith.constant 0 : index
    %3 = vector.load %arg2[%c0, %c0_1] : memref<16x32xf32, #tpu.memory_space<vmem>>, vector<16x32xf32>
    %4 = arith.truncf %3 : vector<16x32xf32> to vector<16x32xbf16>
    %c0_2 = arith.constant 0 : index
    %c0_3 = arith.constant 0 : index
    %5 = vector.load %arg3[%c0_2, %c0_3] : memref<32x64xbf16, #tpu.memory_space<vmem>>, vector<32x64xbf16>
    %cst = arith.constant dense<0.000000e+00> : vector<16x64xf32>
    %6 = tpu.matmul %4, %5, %cst {dimension_numbers = #tpu.dot_dimension_numbers<[1], [0], [0], [1], [0, 0, 1, 1], [], []>} : vector<16x32xbf16>, vector<32x64xbf16>, vector<16x64xf32> -> vector<16x64xf32>
    %c0_4 = arith.constant 0 : index
    %c0_5 = arith.constant 0 : index
    %7 = vector.load %arg4[%c0_4, %c0_5] : memref<1x64xf32, #tpu.memory_space<vmem>>, vector<1x64xf32>
    %8 = vector.broadcast %7 : vector<1x64xf32> to vector<16x64xf32>
    %9 = arith.addf %6, %8 : vector<16x64xf32>
    %cst_6 = arith.constant 0.000000e+00 : f32
    %10 = vector.broadcast %cst_6 : f32 to vector<16x64xf32>
    %11 = arith.maximumf %9, %10 : vector<16x64xf32>
    %c0_7 = arith.constant 0 : index
    %c0_8 = arith.constant 0 : index
    %12 = vector.load %arg8[%c0_7, %c0_8] : memref<16x32xf32, #tpu.memory_space<vmem>>, vector<16x32xf32>
    %13 = arith.truncf %11 : vector<16x64xf32> to vector<16x64xbf16>
    %c0_9 = arith.constant 0 : index
    %c0_10 = arith.constant 0 : index
    %14 = vector.load %arg5[%c0_9, %c0_10] : memref<64x32xbf16, #tpu.memory_space<vmem>>, vector<64x32xbf16>
    %cst_11 = arith.constant dense<0.000000e+00> : vector<16x32xf32>
    %15 = tpu.matmul %13, %14, %cst_11 {dimension_numbers = #tpu.dot_dimension_numbers<[1], [0], [0], [1], [0, 0, 1, 1], [], []>} : vector<16x64xbf16>, vector<64x32xbf16>, vector<16x32xf32> -> vector<16x32xf32>
    %16 = arith.addf %12, %15 : vector<16x32xf32>
    %c0_12 = arith.constant 0 : index
    %c0_13 = arith.constant 0 : index
    %17 = vector.load %arg8[%c0_12, %c0_13] : memref<16x32xf32, #tpu.memory_space<vmem>>, vector<16x32xf32>
    tpu.vector_store %arg8[%c0_12, %c0_13], %16 {strides = array<i32>} : memref<16x32xf32, #tpu.memory_space<vmem>>, vector<16x32xf32>,
    %c0_i32_14 = arith.constant 0 : i32
    %18 = arith.cmpi eq, %arg1, %c0_i32_14 : i32
    %19 = arith.extui %18 : i1 to i32
    %c0_i32_15 = arith.constant 0 : i32
    %20 = arith.cmpi ne, %19, %c0_i32_15 : i32
    scf.if %20 {
      %c0_16 = arith.constant 0 : index
      %c0_17 = arith.constant 0 : index
      %21 = vector.load %arg8[%c0_16, %c0_17] : memref<16x32xf32, #tpu.memory_space<vmem>>, vector<16x32xf32>
      %c0_18 = arith.constant 0 : index
      %c0_19 = arith.constant 0 : index
      %22 = vector.load %arg6[%c0_18, %c0_19] : memref<1x32xf32, #tpu.memory_space<vmem>>, vector<1x32xf32>
      %23 = vector.broadcast %22 : vector<1x32xf32> to vector<16x32xf32>
      %24 = arith.addf %21, %23 : vector<16x32xf32>
      %c0_20 = arith.constant 0 : index
      %c0_21 = arith.constant 0 : index
      %25 = vector.load %arg7[%c0_20, %c0_21] : memref<16x32xf32, #tpu.memory_space<vmem>>, vector<16x32xf32>
      tpu.vector_store %arg7[%c0_20, %c0_21], %24 {strides = array<i32>} : memref<16x32xf32, #tpu.memory_space<vmem>>, vector<16x32xf32>,
    } else {
    }
    return
  }
  func.func @transform_0(%arg0: i32, %arg1: i32) -> (i32, i32) {
    %c0_i32 = arith.constant 0 : i32
    %c0_i32_0 = arith.constant 0 : i32
    return %arg0, %c0_i32 : i32, i32
  }
  func.func @transform_1(%arg0: i32, %arg1: i32) -> (i32, i32) {
    %c0_i32 = arith.constant 0 : i32
    %c0_i32_0 = arith.constant 0 : i32
    return %c0_i32, %arg1 : i32, i32
  }
  func.func @transform_2(%arg0: i32, %arg1: i32) -> (i32, i32) {
    %c0_i32 = arith.constant 0 : i32
    %c0_i32_0 = arith.constant 0 : i32
    %c0_i32_1 = arith.constant 0 : i32
    return %c0_i32, %c0_i32_0 : i32, i32
  }
  func.func @transform_3(%arg0: i32, %arg1: i32) -> (i32, i32) {
    %c0_i32 = arith.constant 0 : i32
    %c0_i32_0 = arith.constant 0 : i32
    return %arg1, %c0_i32 : i32, i32
  }
  func.func @transform_4(%arg0: i32, %arg1: i32) -> (i32, i32) {
    %c0_i32 = arith.constant 0 : i32
    %c0_i32_0 = arith.constant 0 : i32
    %c0_i32_1 = arith.constant 0 : i32
    return %c0_i32, %c0_i32_0 : i32, i32
  }
  func.func @transform_5(%arg0: i32, %arg1: i32) -> (i32, i32) {
    %c0_i32 = arith.constant 0 : i32
    %c0_i32_0 = arith.constant 0 : i32
    return %arg0, %c0_i32 : i32, i32
  }
}

</mosaic_0001>

<bundles_post_ra>
// kernel: tpu_custom_call.1
= control target key start
LH: loop header
LB: loop body
LE: loop exit
PB: predicated region body
PF: predicated region fallthrough
CT: control target
= control target key end

     0   :  { %v291_v1 = vmov 0.0   ;;  %vm292_vm0 = vmmov 0   ;;  %vm26_vm1 = vcmask 261120   ;;  %s375_s0 = inlined_call_operand.vmem [shape: f32[16,32], index: 0, kind: input, shape index: {}]   ;;  %s376_s1 = inlined_call_operand.vmem [shape: bf16[32,64], index: 1, kind: input, shape index: {}]   ;;  %s377_s2 = inlined_call_operand.vmem [shape: f32[1,64], index: 2, kind: input, shape index: {}]   ;;  %s378_s3 = inlined_call_operand.vmem [shape: bf16[64,32], index: 3, kind: input, shape index: {}]   ;;  %s379_s4 = inlined_call_operand.vmem [shape: f32[1,32], index: 4, kind: input, shape index: {}]   ;;  %s380_s5 = inlined_call_operand.hbm [shape: f32[16,32], index: 5, kind: output, shape index: {}]  }
   0x1   :  { %v261_v0 = vld [vmem:[%s376_s1] sm:$0xff]   ;;  %236 = vmatprep.subr.bf16.mxu0 %v291_v1  ;;  %v262_v2 = vld [vmem:[%s376_s1 + $0x8] sm:$0xff]   ;;  %244 = vmatprep.subr.bf16.mxu1 %v291_v1  ;;  %27 = vst.msk [vmem:[#allocation2] sm:$0xff] %vm26_vm1, %v291_v1  ;;  %28 = vst.msk [vmem:[#allocation2 + $0x8] sm:$0xff] %vm26_vm1, %v291_v1 }
   0x2   :  { %237 = vmatpush3.bf16.msra.mxu0 %v261_v0  ;;  %240 = vmatprep.mubr.msk.bf16.mxu0 %vm292_vm0, %v291_v1  ;;  %v29_v3 = vld [vmem:[%s375_s0] sm:$0xff]  ;;  %v30_v4 = vld [vmem:[%s375_s0 + $0x8] sm:$0xff] }
   0x3   :  { %238 = vmatprep.subr.bf16.mxu0 %v291_v1  ;;  %v263_v5 = vld [vmem:[%s378_s3] sm:$0xff]   ;;  %252 = vmatprep.mubr.msk.bf16.mxu1 %vm292_vm0, %v291_v1  ;;  %v264_v6 = vld [vmem:[%s378_s3 + $0x8] sm:$0xff]   ;;  %v31_v7 = vpack.c.bf16 %v30_v4, %v29_v3 }
   0x4   :  { %245 = vmatpush3.bf16.msra.mxu1 %v263_v5 }
   0x5   :  { %246 = vmatprep.subr.bf16.mxu1 %v291_v1 }
   0x6   :  { %239 = vmatpush3.bf16.msra.mxu0 %v262_v2 }
   0x7   :  { %10 = vsyncpa [#allocation4], 0  ;;  %v265_v8 = vld [vmem:[%s378_s3 + $0x10] sm:$0xff]   ;;  %v266_v9 = vld [vmem:[%s378_s3 + $0x18] sm:$0xff]   ;;  %vm137_vm2 = vcmask 523264   ;;  %s293_s9 = smov [#allocation3]  }
   0x8   :  { %247 = vmatpush3.bf16.msra.mxu1 %v264_v6  ;;  %v218_v10 = vld [vmem:[%s377_s2] ss:$0 sm:$0xff]  ;;  %v103_v22 = vld [vmem:[#allocation2 + $0x8] sm:$0xff]  ;;  %s207_s10 = sshll.u32 %s293_s9, 4  ;;  %s208_s10 = int_to_ptr.vmem [resolvable:$true] %s207_s10 }
   0x9   :  { %241 = vmatmul.mubr.msk.bf16.vlgmr.msra.gmra.mrb[0].mxu0 %vm26_vm1, %v31_v7  ;;  %248 = vmatprep.subr.bf16.mxu1 %v291_v1  ;;  %v102_v20 = vld [vmem:[#allocation2] sm:$0xff]  ;;  %s267_s11 = scalar_lea.vmem %s208_s10, 256  ;;  %p272_p1 = scmp.lt.s32.totalorder %s208_s10, %s208_s10 }
   0xa   :  { %v227_v28 = vld [vmem:[%s379_s4] ss:$0 sm:$0xff]  ;;  %p268_p0 = scmp.ne.s32.totalorder %s208_s10, %s267_s11  ;;  %p273_p2 = scmp.lt.s32.totalorder %s267_s11, %s267_s11 }
   0xc   :  { %249 = vmatpush3.bf16.msra.mxu1 %v265_v8  ;;  %p274_p3 = por %p273_p2, %p272_p1 }
   0xd   :  { %250 = vmatprep.subr.bf16.mxu1 %v291_v1 }
   0xe   :  { %p275_p4 = pnand %p274_p3, %p268_p0 }
  0x10   :  { %251 = vmatpush3.bf16.msra.mxu1 %v266_v9 }
  0xdc   :  { %v93_v11 = vpop.f32.mrb[0].mxu0 }
  0xdd   :  { %v94_v12 = vadd.f32 %v218_v10, %v93_v11  ;;  %v242_v13 = vpop.f32.mrb[1].mxu0 }
  0xde   :  { %v96_v14 = vpop.f32.mrb[2].mxu0 }
  0xdf   :  { %v97_v15 = vadd.f32 %v218_v10, %v96_v14  ;;  %v243_v16 = vpop.f32.mrb[3].mxu0  ;;  %v100_v17 = vmax.f32 %v94_v12, 0.0 }
  0xe1   :  { %v101_v18 = vmax.f32 %v97_v15, 0.0 }
  0xe3   :  { %v104_v19 = vpack.c.bf16 %v101_v18, %v100_v17 }
  0xe5   :  { %253 = vmatmul.mubr.msk.bf16.vlgmr.msra.gmra.mrb[0].mxu1 %vm137_vm2, %v104_v19 }
 0x1b8   :  { %v175_v21 = vpop.f32.mrb[0].mxu1 }
 0x1b9   :  { %v182_v23 = vadd.f32 %v175_v21, %v102_v20  ;;  %v254_v24 = vpop.f32.mrb[1].mxu1 }
 0x1ba   :  { %v178_v25 = vpop.f32.mrb[2].mxu1 }
 0x1bb   :  { %184 = vst.msk [vmem:[#allocation2] sm:$0xff] %vm26_vm1, %v182_v23  ;;  %v183_v26 = vadd.f32 %v178_v25, %v103_v22  ;;  %v255_v27 = vpop.f32.mrb[3].mxu1 }
 0x1bd   :  { %185 = vst.msk [vmem:[#allocation2 + $0x8] sm:$0xff] %vm26_vm1, %v183_v26 }
 0x1c2   :  { %v189_v29 = vld [vmem:[#allocation2] sm:$0xff] }
 0x1c3   :  { %v198_v30 = vadd.f32 %v227_v28, %v189_v29 }
 0x1c4   :  { %v190_v31 = vld [vmem:[#allocation2 + $0x8] sm:$0xff] }
 0x1c5   :  { %v199_v32 = vadd.f32 %v227_v28, %v190_v31  ;;  %200 = vst.msk [vmem:[#allocation3] sm:$0xff] %vm26_vm1, %v198_v30 }
 0x1c7   :  { %201 = vst.msk [vmem:[#allocation3 + $0x8] sm:$0xff] %vm26_vm1, %v199_v32 }
 0x1c8   :  { %278 = shalt.err (!%p275_p4)
}
 0x1c9   :  { %s279_s13 = scalar_lea.hbm %s380_s5, 256 }
 0x1ca   :  { %p280_p5 = scmp.ne.s32.totalorder %s380_s5, %s279_s13  ;;  %p283_p6 = scmp.lt.u32.totalorder %s279_s13, %s380_s5 }
 0x1cc   :  { %p285_p7 = pnand %p283_p6, %p280_p5 }
 0x1ce   :  { %288 = shalt.err (!%p285_p7)
}
 0x1cf   :  { %s294_s18 = smov 128   ;;  %s295_s19 = smov 8  }
 0x1d0   :  { %213 = dma.vmem_to_hbm [thread:$0]  %s208_s10, 256, %s380_s5, [#allocation4], %s294_s18, %s294_s18, %s295_s19  }
 0x1d1   :  { %289 = dma.done.wait [#allocation4], 256  }
 0x1d2   :  { %290 = vsyncadd [#allocation4], 4294967040 }
 0x1d3   :  { %217 = vsyncpa [#allocation4], 1 }

</bundles_post_ra>
